<compile_context>
chip_gen: v7x
topology: tpu7x:2x2x1
jax: 0.10.0
libtpu: 0.0.40
codegen_flags: <defaults>
</compile_context>

<pallas_src>
import jax
import jax.numpy as jnp
from jax.experimental import pallas as pl
from jax.experimental.pallas import tpu as pltpu

# ---------------------------------------------------------------------------
# Packed-parameter buffer layout (rows x 128 lanes, f32), feature-major:
#   rows   0..127 : W2f_pad   row m = w2[:, m] for m < 64, rows 64..127 = 0
#   rows 128..135 : WMU block row 128 lanes 0..63 = wmu, everything else 0
#   rows 136..263 : column block (128 x 128):
#                     lane 0    : b1 (128 values)
#                     lanes 1..4: W1f columns, lane 1+k row m = w1[k, m]
#                     lane 5    : b2 (rows 136..199), zeros below
#                     lane 6    : bmu at row 136 (rest zero)
# ---------------------------------------------------------------------------
W2_ROWS = 0
WMU_ROWS = 128
COL_ROWS = 136
PACK_ROWS = 264          # multiple of 8 sublanes

TB_MAX = 4096            # batch-tile cap (multiple of 128)


def _leaky_relu(x, slope=0.01):
    # F.leaky_relu default negative_slope = 0.01
    return jnp.where(x > 0, x, slope * x)


def actor_net_kernel(p_ref, x_ref, mu_ref):
    """One feature-major batch tile of the ActorNet forward (params resident)."""
    x = x_ref[...]                                          # (4, TB)
    CB = COL_ROWS

    # fc1 on the VPU: 4 broadcast multiply-accumulates.
    #   (128,1) weight/bias columns  x  (1,TB) input rows  ->  (128, TB)
    h1 = p_ref[CB:CB + 128, 0:1]                            # b1 column
    h1 = h1 + p_ref[CB:CB + 128, 1:2] * x[0:1, :]
    h1 = h1 + p_ref[CB:CB + 128, 2:3] * x[1:2, :]
    h1 = h1 + p_ref[CB:CB + 128, 3:4] * x[2:3, :]
    h1 = h1 + p_ref[CB:CB + 128, 4:5] * x[3:4, :]
    h1 = _leaky_relu(h1)                                    # (128, TB)

    # fc2 on the MXU.  Rows 64..127 of W2f/b2 are zero, so h2 rows 64..127
    # stay exactly zero through the bias add and leaky_relu.
    h2 = jnp.dot(p_ref[W2_ROWS:W2_ROWS + 128, :], h1,
                 preferred_element_type=jnp.float32)        # (128, TB)
    h2 = _leaky_relu(h2 + p_ref[CB:CB + 128, 5:6])          # + b2 column

    # fc_mu on the MXU: (8,128) @ (128,TB) -> (8,TB); only row 0 is wmu,
    # rows 1..7 are zero filler.  Row 0 is the lane-dense mu row.
    mu8 = jnp.dot(p_ref[WMU_ROWS:WMU_ROWS + 8, :], h2,
                  preferred_element_type=jnp.float32)       # (8, TB)
    mu = mu8[0:1, :] + p_ref[CB:CB + 1, 6:7]                # + bmu, (1, TB)
    mu_ref[...] = 1.5 * jnp.tanh(mu)


def pack_actor_params(params):
    """Pack (w1, b1, w2, b2, wmu, bmu) into one (264, 128) f32 buffer.

    Weights must be in (in, out) layout.  If loading real PyTorch ActorNet
    weights, nn.Linear.weight is (out, in) and must be transposed first;
    fc3 is unused in forward and must be excluded.
    Do this once per weight update (host/JAX side), not per forward call.
    """
    w1, b1, w2, b2, wmu, bmu = params
    w1 = jnp.asarray(w1, jnp.float32).reshape(4, 128)       # (in=4,   out=128)
    b1 = jnp.asarray(b1, jnp.float32).reshape(128)
    w2 = jnp.asarray(w2, jnp.float32).reshape(128, 64)      # (in=128, out=64)
    b2 = jnp.asarray(b2, jnp.float32).reshape(64)
    wmu = jnp.asarray(wmu, jnp.float32).reshape(64)         # (in=64,  out=1)
    bmu = jnp.asarray(bmu, jnp.float32).reshape(())

    P = jnp.zeros((PACK_ROWS, 128), jnp.float32)
    P = P.at[W2_ROWS:W2_ROWS + 64, :].set(w2.T)             # W2f rows 0..63
    P = P.at[WMU_ROWS, 0:64].set(wmu)                       # wmu row
    P = P.at[COL_ROWS:COL_ROWS + 128, 0].set(b1)            # b1 column
    P = P.at[COL_ROWS:COL_ROWS + 128, 1:5].set(w1.T)        # W1f columns
    P = P.at[COL_ROWS:COL_ROWS + 64, 5].set(b2)             # b2 column (padded)
    P = P.at[COL_ROWS, 6].set(bmu)                          # bmu scalar
    return P


def _choose_batch_tile(B):
    """Batch tile: full block for small B, else a multiple of 128.

    Large tiles amortize the ~0.35us per-grid-step overhead; the tile is
    shrunk (down to 256) so the grid keeps >= 2 parallel steps when possible,
    letting the batch axis shard across v7x's two TensorCores.
    """
    if B <= 256:
        return B                       # single full block (allowed: == array dim)
    tb = TB_MAX
    while tb > 256 and (B + tb - 1) // tb < 2:
        tb //= 2
    return tb


def actor_net_forward(x, packed_params):
    """x: (B, 4) float32 -> mu: (B, 1) float32."""
    B = x.shape[0]
    xT = jnp.transpose(x).astype(jnp.float32)               # (4, B) feature-major
    TB = _choose_batch_tile(B)
    grid = (pl.cdiv(B, TB),)                                # ragged last block OK

    out = pl.pallas_call(
        actor_net_kernel,
        out_shape=jax.ShapeDtypeStruct((1, B), jnp.float32),
        grid=grid,
        in_specs=[
            # Packed params: one block, constant index_map -> stays resident.
            pl.BlockSpec((PACK_ROWS, 128), lambda i: (0, 0)),
            # Feature-major input tiled over batch (lane) axis.
            pl.BlockSpec((4, TB), lambda i: (0, i)),
        ],
        # Lane-dense mu row per grid step.
        out_specs=pl.BlockSpec((1, TB), lambda i: (0, i)),
        compiler_params=pltpu.CompilerParams(
            dimension_semantics=("parallel",),
            vmem_limit_bytes=32 * 1024 * 1024),
    )(packed_params, xT)
    return out.reshape(B, 1)


def init_actor_params(key):
    """Deterministic parameter init mirroring ActorNet.__init__ shapes.

    fc1: Linear(4, 128)   weight kaiming_normal_, bias default
    fc2: Linear(128, 64)  weight kaiming_normal_, bias default
    fc_mu: Linear(64, 1)  weight & bias uniform(-0.003, 0.003)
    Weights returned as (in, out) for row-vector matmul.
    (fc3 is never used in forward and is omitted.)
    """
    k1, k2, k3, k4, k5, k6 = jax.random.split(key, 6)

    def kaiming_normal(k, fan_in, fan_out):
        std = jnp.sqrt(2.0 / fan_in)
        return jax.random.normal(k, (fan_in, fan_out), jnp.float32) * std

    def default_bias(k, fan_in, fan_out):
        bound = 1.0 / jnp.sqrt(float(fan_in))
        return jax.random.uniform(k, (1, fan_out), jnp.float32, -bound, bound)

    w1 = kaiming_normal(k1, 4, 128)
    b1 = default_bias(k2, 4, 128)
    w2 = kaiming_normal(k3, 128, 64)
    b2 = default_bias(k4, 128, 64)
    wmu = jax.random.uniform(k5, (64, 1), jnp.float32, -0.003, 0.003)
    bmu = jax.random.uniform(k6, (1, 1), jnp.float32, -0.003, 0.003)
    return (w1, b1, w2, b2, wmu, bmu)


def actor_net_reference(x, params):
    """Pure-JAX reference for correctness check."""
    w1, b1, w2, b2, wmu, bmu = params
    h1 = _leaky_relu(x @ w1 + b1)
    h2 = _leaky_relu(h1 @ w2 + b2)
    return 1.5 * jnp.tanh(h2 @ wmu + bmu)


if __name__ == "__main__":
    key = jax.random.PRNGKey(0)
    kx, kp = jax.random.split(key)

    params = init_actor_params(kp)
    packed = pack_actor_params(params)

    # Small-batch path (single full block).
    B = 8
    x = jax.random.normal(kx, (B, 4), jnp.float32)           # state dim = 4
    mu = jax.block_until_ready(actor_net_forward(x, packed))
    ref = actor_net_reference(x, params)
    assert mu.shape == (B, 1)
    assert jnp.allclose(mu, ref, atol=1e-5, rtol=1e-5)

    # Multi-step grid path with a ragged last block (no wrapper padding).
    B2 = 300
    x2 = jax.random.normal(jax.random.PRNGKey(1), (B2, 4), jnp.float32)
    mu2 = jax.block_until_ready(actor_net_forward(x2, packed))
    ref2 = actor_net_reference(x2, params)
    assert mu2.shape == (B2, 1)
    assert jnp.allclose(mu2, ref2, atol=1e-5, rtol=1e-5)

    print("KERNEL_OK")
</pallas_src>

<mosaic_0001>
module attributes {stable_mosaic.version = 11 : i64} {
  func.func @actor_net_kernel(%arg0: i32, %arg1: memref<264x128xf32, #tpu.memory_space<vmem>>, %arg2: memref<4x8xf32, #tpu.memory_space<vmem>>, %arg3: memref<1x8xf32, #tpu.memory_space<vmem>>) attributes {dimension_semantics = [#tpu.dimension_semantics<parallel>], iteration_bounds = array<i64: 1>, scalar_prefetch = 0 : i64, scratch_operands = 0 : i64, tpu.core_type = #tpu.core_type<tc>, window_params = [{pipeline_mode = #tpu.pipeline_mode<synchronous>, transform_indices = @transform_0, window_bounds = array<i64: 264, 128>}, {transform_indices = @transform_1, window_bounds = array<i64: 4, 8>}, {transform_indices = @transform_2, window_bounds = array<i64: 1, 8>}]} {
    %c0 = arith.constant 0 : index
    %c0_0 = arith.constant 0 : index
    %0 = vector.load %arg2[%c0, %c0_0] : memref<4x8xf32, #tpu.memory_space<vmem>>, vector<4x8xf32>
    %c136 = arith.constant 136 : index
    %c0_1 = arith.constant 0 : index
    %1 = vector.load %arg1[%c136, %c0_1] : memref<264x128xf32, #tpu.memory_space<vmem>>, vector<128x1xf32>
    %c136_2 = arith.constant 136 : index
    %c1 = arith.constant 1 : index
    %2 = vector.load %arg1[%c136_2, %c1] : memref<264x128xf32, #tpu.memory_space<vmem>>, vector<128x1xf32>
    %3 = vector.extract_strided_slice %0 {offsets = [0, 0], sizes = [1, 8], strides = [1, 1]} : vector<4x8xf32> to vector<1x8xf32>
    %4 = vector.broadcast %2 : vector<128x1xf32> to vector<128x8xf32>
    %5 = vector.broadcast %3 : vector<1x8xf32> to vector<128x8xf32>
    %6 = arith.mulf %4, %5 : vector<128x8xf32>
    %7 = vector.broadcast %1 : vector<128x1xf32> to vector<128x8xf32>
    %8 = arith.addf %7, %6 : vector<128x8xf32>
    %c136_3 = arith.constant 136 : index
    %c2 = arith.constant 2 : index
    %9 = vector.load %arg1[%c136_3, %c2] : memref<264x128xf32, #tpu.memory_space<vmem>>, vector<128x1xf32>
    %10 = vector.extract_strided_slice %0 {offsets = [1, 0], sizes = [1, 8], strides = [1, 1]} : vector<4x8xf32> to vector<1x8xf32>
    %11 = vector.broadcast %9 : vector<128x1xf32> to vector<128x8xf32>
    %12 = vector.broadcast %10 : vector<1x8xf32> to vector<128x8xf32>
    %13 = arith.mulf %11, %12 : vector<128x8xf32>
    %14 = arith.addf %8, %13 : vector<128x8xf32>
    %c136_4 = arith.constant 136 : index
    %c3 = arith.constant 3 : index
    %15 = vector.load %arg1[%c136_4, %c3] : memref<264x128xf32, #tpu.memory_space<vmem>>, vector<128x1xf32>
    %16 = vector.extract_strided_slice %0 {offsets = [2, 0], sizes = [1, 8], strides = [1, 1]} : vector<4x8xf32> to vector<1x8xf32>
    %17 = vector.broadcast %15 : vector<128x1xf32> to vector<128x8xf32>
    %18 = vector.broadcast %16 : vector<1x8xf32> to vector<128x8xf32>
    %19 = arith.mulf %17, %18 : vector<128x8xf32>
    %20 = arith.addf %14, %19 : vector<128x8xf32>
    %c136_5 = arith.constant 136 : index
    %c4 = arith.constant 4 : index
    %21 = vector.load %arg1[%c136_5, %c4] : memref<264x128xf32, #tpu.memory_space<vmem>>, vector<128x1xf32>
    %22 = vector.extract_strided_slice %0 {offsets = [3, 0], sizes = [1, 8], strides = [1, 1]} : vector<4x8xf32> to vector<1x8xf32>
    %23 = vector.broadcast %21 : vector<128x1xf32> to vector<128x8xf32>
    %24 = vector.broadcast %22 : vector<1x8xf32> to vector<128x8xf32>
    %25 = arith.mulf %23, %24 : vector<128x8xf32>
    %26 = arith.addf %20, %25 : vector<128x8xf32>
    %cst = arith.constant 0.000000e+00 : f32
    %27 = vector.broadcast %cst : f32 to vector<128x8xf32>
    %28 = arith.cmpf ogt, %26, %27 : vector<128x8xf32>
    %cst_6 = arith.constant 0.00999999977 : f32
    %29 = vector.broadcast %cst_6 : f32 to vector<128x8xf32>
    %30 = arith.mulf %29, %26 : vector<128x8xf32>
    %31 = arith.select %28, %26, %30 : vector<128x8xi1>, vector<128x8xf32>
    %c0_7 = arith.constant 0 : index
    %c0_8 = arith.constant 0 : index
    %32 = vector.load %arg1[%c0_7, %c0_8] : memref<264x128xf32, #tpu.memory_space<vmem>>, vector<128x128xf32>
    %cst_9 = arith.constant dense<0.000000e+00> : vector<128x8xf32>
    %33 = tpu.matmul %32, %31, %cst_9 {dimension_numbers = #tpu.dot_dimension_numbers<[1], [0], [0], [1], [0, 0, 1, 1], [], []>} : vector<128x128xf32>, vector<128x8xf32>, vector<128x8xf32> -> vector<128x8xf32>
    %c136_10 = arith.constant 136 : index
    %c5 = arith.constant 5 : index
    %34 = vector.load %arg1[%c136_10, %c5] : memref<264x128xf32, #tpu.memory_space<vmem>>, vector<128x1xf32>
    %35 = vector.broadcast %34 : vector<128x1xf32> to vector<128x8xf32>
    %36 = arith.addf %33, %35 : vector<128x8xf32>
    %cst_11 = arith.constant 0.000000e+00 : f32
    %37 = vector.broadcast %cst_11 : f32 to vector<128x8xf32>
    %38 = arith.cmpf ogt, %36, %37 : vector<128x8xf32>
    %cst_12 = arith.constant 0.00999999977 : f32
    %39 = vector.broadcast %cst_12 : f32 to vector<128x8xf32>
    %40 = arith.mulf %39, %36 : vector<128x8xf32>
    %41 = arith.select %38, %36, %40 : vector<128x8xi1>, vector<128x8xf32>
    %c128 = arith.constant 128 : index
    %c0_13 = arith.constant 0 : index
    %42 = vector.load %arg1[%c128, %c0_13] : memref<264x128xf32, #tpu.memory_space<vmem>>, vector<8x128xf32>
    %cst_14 = arith.constant dense<0.000000e+00> : vector<8x8xf32>
    %43 = tpu.matmul %42, %41, %cst_14 {dimension_numbers = #tpu.dot_dimension_numbers<[1], [0], [0], [1], [0, 0, 1, 1], [], []>} : vector<8x128xf32>, vector<128x8xf32>, vector<8x8xf32> -> vector<8x8xf32>
    %44 = vector.extract_strided_slice %43 {offsets = [0, 0], sizes = [1, 8], strides = [1, 1]} : vector<8x8xf32> to vector<1x8xf32>
    %c136_15 = arith.constant 136 : index
    %c6 = arith.constant 6 : index
    %45 = vector.load %arg1[%c136_15, %c6] : memref<264x128xf32, #tpu.memory_space<vmem>>, vector<1x1xf32>
    %46 = vector.broadcast %45 : vector<1x1xf32> to vector<1x8xf32>
    %47 = arith.addf %44, %46 : vector<1x8xf32>
    %48 = math.tanh %47 : vector<1x8xf32>
    %cst_16 = arith.constant 1.500000e+00 : f32
    %49 = vector.broadcast %cst_16 : f32 to vector<1x8xf32>
    %50 = arith.mulf %49, %48 : vector<1x8xf32>
    %c0_17 = arith.constant 0 : index
    %c0_18 = arith.constant 0 : index
    %51 = vector.load %arg3[%c0_17, %c0_18] : memref<1x8xf32, #tpu.memory_space<vmem>>, vector<1x8xf32>
    tpu.vector_store %arg3[%c0_17, %c0_18], %50 {strides = array<i32>} : memref<1x8xf32, #tpu.memory_space<vmem>>, vector<1x8xf32>,
    return
  }
  func.func @transform_0(%arg0: i32) -> (i32, i32) {
    %c0_i32 = arith.constant 0 : i32
    %c0_i32_0 = arith.constant 0 : i32
    %c0_i32_1 = arith.constant 0 : i32
    return %c0_i32, %c0_i32_0 : i32, i32
  }
  func.func @transform_1(%arg0: i32) -> (i32, i32) {
    %c0_i32 = arith.constant 0 : i32
    %c0_i32_0 = arith.constant 0 : i32
    return %c0_i32, %arg0 : i32, i32
  }
  func.func @transform_2(%arg0: i32) -> (i32, i32) {
    %c0_i32 = arith.constant 0 : i32
    %c0_i32_0 = arith.constant 0 : i32
    return %c0_i32, %arg0 : i32, i32
  }
}

</mosaic_0001>

<bundles_post_ra>
// kernel: tpu_custom_call.1
= control target key start
LH: loop header
LB: loop body
LE: loop exit
PB: predicated region body
PF: predicated region fallthrough
CT: control target
= control target key end

     0   :  { %7 = vsyncpa [#allocation3], 0  ;;  %s1698_s0 = inlined_call_operand.hbm [shape: f32[264,128], index: 0, kind: input, shape index: {}]   ;;  %s1699_s1 = inlined_call_operand.hbm [shape: f32[4,8], index: 1, kind: input, shape index: {}]   ;;  %s1700_s2 = inlined_call_operand.hbm [shape: f32[1,8], index: 2, kind: output, shape index: {}]  }
   0x1   :  { %8 = vsyncpa [#allocation6], 0 }
   0x2   :  { %9 = vsyncpa [#allocation4], 0  ;;  %s1289_s9 = smov [#allocation2]   ;;  %s1217_s13 = scalar_lea.hbm %s1698_s0, 4224 }
   0x3   :  { %s15_s10 = sshll.u32 %s1289_s9, 4  ;;  %p1218_p0 = scmp.ne.s32.totalorder %s1698_s0, %s1217_s13  ;;  %s16_s10 = int_to_ptr.vmem [resolvable:$true] %s15_s10 }
   0x4   :  { %p1221_p1 = scmp.lt.u32.totalorder %s1217_s13, %s1698_s0 }
   0x6   :  { %p1223_p2 = pnand %p1221_p1, %p1218_p0 }
   0x8   :  { %1226 = shalt.err (!%p1223_p2)
}
   0x9   :  { %s1227_s18 = scalar_lea.vmem %s16_s10, 4224  ;;  %p1232_p4 = scmp.lt.s32.totalorder %s16_s10, %s16_s10 }
   0xa   :  { %p1228_p3 = scmp.ne.s32.totalorder %s16_s10, %s1227_s18  ;;  %p1233_p5 = scmp.lt.s32.totalorder %s1227_s18, %s1227_s18 }
   0xc   :  { %p1234_p6 = por %p1233_p5, %p1232_p4 }
   0xe   :  { %p1235_p7 = pnand %p1234_p6, %p1228_p3 }
  0x10   :  { %1238 = shalt.err (!%p1235_p7)
}
  0x11   :  { %s1290_s19 = smov 128   ;;  %s1291_s20 = smov 8  }
  0x12   :  { %21 = dma.hbm_to_vmem [thread:$0]  %s1698_s0, 4224, %s16_s10, [#allocation3], %s1290_s19, %s1290_s19, %s1291_s20  }
  0x13   :  { %s1292_s23 = smov [#allocation5]   ;;  %s1239_s27 = scalar_lea.hbm %s1699_s1, 64 }
  0x14   :  { %s28_s24 = sshll.u32 %s1292_s23, 4  ;;  %p1240_p8 = scmp.ne.s32.totalorder %s1699_s1, %s1239_s27  ;;  %s29_s24 = int_to_ptr.vmem [resolvable:$true] %s28_s24 }
  0x15   :  { %p1243_p9 = scmp.lt.u32.totalorder %s1239_s27, %s1699_s1 }
  0x17   :  { %p1245_p10 = pnand %p1243_p9, %p1240_p8 }
  0x19   :  { %1248 = shalt.err (!%p1245_p10)
}
  0x1a   :  { %s1249_s4 = scalar_lea.vmem %s29_s24, 64  ;;  %p1254_p12 = scmp.lt.s32.totalorder %s29_s24, %s29_s24 }
  0x1b   :  { %p1250_p11 = scmp.ne.s32.totalorder %s29_s24, %s1249_s4  ;;  %p1255_p13 = scmp.lt.s32.totalorder %s1249_s4, %s1249_s4 }
  0x1d   :  { %p1256_p0 = por %p1255_p13, %p1254_p12 }
  0x1f   :  { %p1257_p1 = pnand %p1256_p0, %p1250_p11 }
  0x21   :  { %1260 = shalt.err (!%p1257_p1)
}
  0x22   :  { %31 = dma.hbm_to_vmem [thread:$0]  %s1699_s1, 64, %s29_s24, [#allocation6]  }
  0x23   :  { %1283 = dma.done.wait [#allocation3], 4224  }
  0x24   :  { %1284 = vsyncadd [#allocation3], 4294963072 }
  0x25   :  { %1285 = dma.done.wait [#allocation6], 64  }
  0x26   :  { %1286 = vsyncadd [#allocation6], 4294967232  ;;  %v1703_v0 = vmov 3   ;;  %v1702_v1 = vmov 0   ;;  %v1345_v2 = vld [vmem:[#allocation2 + $0xa0] sm:$0xff]  ;;  %v1347_v3 = vld [vmem:[#allocation2 + $0x88] sm:$0xff]  ;;  %v135_v45 = vlaneseq }
  0x27   :  { %1174 = vset.pattern.permute.xlu0 %v1703_v0  ;;  %1165 = vset.pattern.permute.xlu1 %v1702_v1  ;;  %v1351_v4 = vld [vmem:[#allocation2 + $0xa8] sm:$0xff]  ;;  %v1353_v5 = vld [vmem:[#allocation2 + $0x90] sm:$0xff]  ;;  %v1705_v6 = vmov 4   ;;  %v1701_v7 = vmov 2   ;;  %v1361_v8 = vld [vmem:[#allocation2 + $0x98] sm:$0xff]  ;;  %v1707_v9 = vmov 1  }
  0x28   :  { %348 = vperm.xlu0 %1174, %v1345_v2   ;;  %156 = vperm.xlu1 %1165, %v1347_v3   ;;  %v1366_v10 = vld [vmem:[#allocation2 + $0xd0] sm:$0xff]  ;;  %v1370_v11 = vld [vmem:[#allocation2 + $0xd8] sm:$0xff]  ;;  %v1393_v13 = vld [vmem:[#allocation2 + $0x100] sm:$0xff]  ;;  %v136_v48 = vshrl.u32 %v135_v45, 7  ;;  %s1303_s1 = smov [#allocation7]  }
  0x29   :  { %v1388_v12 = vld [vmem:[#allocation2 + $0xb0] sm:$0xff]  ;;  %v1401_v14 = vld [vmem:[#allocation2 + $0xc0] sm:$0xff]  ;;  %v1405_v15 = vld [vmem:[#allocation2 + $0xc8] sm:$0xff]  ;;  %s944_s6 = sshll.u32 %s1303_s1, 4  ;;  %s945_s6 = int_to_ptr.vmem [resolvable:$true] %s944_s6 }
  0x2a   :  { %v1409_v16 = vld [vmem:[#allocation2 + $0xf0] sm:$0xff]  ;;  %v1414_v17 = vld [vmem:[#allocation2 + $0xf8] sm:$0xff]  ;;  %v1470_v25 = vld [vmem:[#allocation2 + $0xe0] sm:$0xff]  ;;  %v137_v50 = vsub.s32 0, %v136_v48  ;;  %v301_v54 = vsub.s32 1, %v136_v48  ;;  %v401_v61 = vsub.s32 2, %v136_v48  ;;  %p1266_p3 = scmp.lt.s32.totalorder %s945_s6, %s945_s6 }
  0x2b   :  { %v1419_v18 = vld [vmem:[#allocation2 + $0xb8] sm:$0xff]  ;;  %v1497_v39 = vld [vmem:[#allocation2 + $0xe8] sm:$0xff]  ;;  %v501_v62 = vsub.s32 3, %v136_v48  ;;  %s1261_s7 = scalar_lea.vmem %s945_s6, 16  ;;  %s1265_s8 = scalar_lea.vmem %s945_s6, 32 }
  0x2c   :  { %352 = vperm.xlu0 %1174, %v1351_v4   ;;  %160 = vperm.xlu1 %1165, %v1353_v5   ;;  %v38_v52 = vld [vmem:[#allocation5] sm:$0xf]  ;;  %p1262_p2 = scmp.ne.s32.totalorder %s945_s6, %s1261_s7  ;;  %p1267_p4 = scmp.lt.s32.totalorder %s1265_s8, %s1261_s7 }
  0x2d   :  { %v1520_v55 = vrot.slane %v38_v52, %v137_v50  ;;  %v1527_v58 = vrot.slane %v38_v52, %v301_v54 }
  0x2e   :  { %p1268_p5 = por %p1267_p4, %p1266_p3 }
  0x30   :  { %1179 = vset.pattern.permute.xlu0 %v1705_v6  ;;  %1166 = vset.pattern.permute.xlu1 %v1701_v7  ;;  %p1269_p6 = pnand %p1268_p5, %p1262_p2 }
  0x31   :  { %448 = vperm.xlu0 %1179, %v1345_v2   ;;  %240 = vperm.xlu1 %1166, %v1353_v5  }
  0x35   :  { %452 = vperm.xlu0 %1179, %v1351_v4   ;;  %1167 = vset.pattern.permute.xlu1 %v1707_v9 }
  0x36   :  { %67 = vperm.xlu1 %1167, %v1361_v8  }
  0x39   :  { %472 = vperm.xlu0 %1179, %v1366_v10  }
  0x3a   :  { %1168 = vset.pattern.permute.xlu1 %v1703_v0 }
  0x3b   :  { %336 = vperm.xlu1 %1168, %v1347_v3  }
  0x3d   :  { %476 = vperm.xlu0 %1179, %v1370_v11  }
  0x3f   :  { %340 = vperm.xlu1 %1168, %v1353_v5  }
  0x41   :  { %1198 = vset.pattern.permute.xlu0 %v1707_v9 }
  0x42   :  { %57 = vperm.xlu0 %1198, %v1347_v3  }
  0x43   :  { %1169 = vset.pattern.permute.xlu1 %v1702_v1 }
  0x44   :  { %168 = vperm.xlu1 %1169, %v1345_v2  }
  0x46   :  { %62 = vperm.xlu0 %1198, %v1353_v5  }
  0x48   :  { %1170 = vset.pattern.permute.xlu1 %v1701_v7 }
  0x49   :  { %244 = vperm.xlu1 %1170, %v1361_v8  }
  0x4a   :  { %72 = vperm.xlu0 %1198, %v1345_v2  }
  0x4d   :  { %1171 = vset.pattern.permute.xlu1 %v1705_v6 }
  0x4e   :  { %77 = vperm.xlu0 %1198, %v1351_v4   ;;  %436 = vperm.xlu1 %1171, %v1347_v3  }
  0x52   :  { %102 = vperm.xlu0 %1198, %v1366_v10   ;;  %440 = vperm.xlu1 %1171, %v1353_v5  }
  0x56   :  { %107 = vperm.xlu0 %1198, %v1370_v11   ;;  %1172 = vset.pattern.permute.xlu1 %v1707_v9 }
  0x57   :  { %82 = vperm.xlu1 %1172, %v1388_v12  }
  0x5a   :  { %132 = vperm.xlu0 %1198, %v1393_v13  }
  0x5b   :  { %1173 = vset.pattern.permute.xlu1 %v1703_v0 }
  0x5c   :  { %344 = vperm.xlu1 %1173, %v1361_v8  }
  0x5e   :  { %1201 = vset.pattern.permute.xlu0 %v1702_v1 }
  0x5f   :  { %164 = vperm.xlu0 %1201, %v1361_v8  }
  0x60   :  { %1175 = vset.pattern.permute.xlu1 %v1702_v1 }
  0x61   :  { %172 = vperm.xlu1 %1175, %v1351_v4  }
  0x63   :  { %184 = vperm.xlu0 %1201, %v1401_v14  }
  0x65   :  { %176 = vperm.xlu1 %1175, %v1388_v12  }
  0x67   :  { %188 = vperm.xlu0 %1201, %v1405_v15  }
  0x69   :  { %1176 = vset.pattern.permute.xlu1 %v1701_v7 }
  0x6a   :  { %256 = vperm.xlu1 %1176, %v1388_v12  }
  0x6b   :  { %208 = vperm.xlu0 %1201, %v1409_v16  }
  0x6e   :  { %1177 = vset.pattern.permute.xlu1 %v1705_v6 }
  0x6f   :  { %212 = vperm.xlu0 %1201, %v1414_v17   ;;  %444 = vperm.xlu1 %1177, %v1361_v8  }
  0x73   :  { %1203 = vset.pattern.permute.xlu0 %v1701_v7  ;;  %1178 = vset.pattern.permute.xlu1 %v1707_v9 }
  0x74   :  { %236 = vperm.xlu0 %1203, %v1347_v3   ;;  %87 = vperm.xlu1 %1178, %v1419_v18  }
  0x78   :  { %248 = vperm.xlu0 %1203, %v1345_v2   ;;  %92 = vperm.xlu1 %1178, %v1401_v14  }
  0x7c   :  { %252 = vperm.xlu0 %1203, %v1351_v4   ;;  %1180 = vset.pattern.permute.xlu1 %v1703_v0 }
  0x7d   :  { %356 = vperm.xlu1 %1180, %v1388_v12  }
  0x80   :  { %272 = vperm.xlu0 %1203, %v1366_v10  }
  0x81   :  { %1181 = vset.pattern.permute.xlu1 %v1702_v1 }
  0x82   :  { %180 = vperm.xlu1 %1181, %v1419_v18  }
  0x84   :  { %276 = vperm.xlu0 %1203, %v1370_v11  }
  0x86   :  { %1182 = vset.pattern.permute.xlu1 %v1701_v7 }
  0x87   :  { %260 = vperm.xlu1 %1182, %v1419_v18  }
  0x88   :  { %296 = vperm.xlu0 %1203, %v1393_v13  }
  0x8b   :  { %264 = vperm.xlu1 %1182, %v1401_v14  }
  0x8c   :  { %1206 = vset.pattern.permute.xlu0 %v1703_v0 }
  0x8d   :  { %372 = vperm.xlu0 %1206, %v1366_v10  }
  0x8f   :  { %1183 = vset.pattern.permute.xlu1 %v1705_v6 }
  0x90   :  { %456 = vperm.xlu1 %1183, %v1388_v12  }
  0x91   :  { %376 = vperm.xlu0 %1206, %v1370_v11  }
  0x94   :  { %1184 = vset.pattern.permute.xlu1 %v1707_v9 }
  0x95   :  { %97 = vperm.xlu1 %1184, %v1405_v15   ;;  %392 = vperm.xlu0 %1206, %v1414_v17  }
  0x99   :  { %1185 = vset.pattern.permute.xlu1 %v1703_v0  ;;  %1210 = vset.pattern.permute.xlu0 %v1705_v6 }
  0x9a   :  { %360 = vperm.xlu1 %1185, %v1419_v18   ;;  %496 = vperm.xlu0 %1210, %v1393_v13  }
  0x9e   :  { %364 = vperm.xlu1 %1185, %v1401_v14  }
  0xa2   :  { %1186 = vset.pattern.permute.xlu1 %v1702_v1 }
  0xa3   :  { %192 = vperm.xlu1 %1186, %v1366_v10  }
  0xa7   :  { %1187 = vset.pattern.permute.xlu1 %v1701_v7  ;;  %v1454_v19 = vpop.permute.xlu1 %156  ;;  %v1456_v20 = vpop.permute.xlu0 %348 }
  0xa8   :  { %268 = vperm.xlu1 %1187, %v1405_v15  }
  0xab   :  { %v1459_v21 = vpop.permute.xlu1 %160  ;;  %v1461_v22 = vpop.permute.xlu0 %352 }
  0xac   :  { %1188 = vset.pattern.permute.xlu1 %v1705_v6 }
  0xad   :  { %460 = vperm.xlu1 %1188, %v1419_v18  }
  0xb0   :  { %v1465_v23 = vpop.permute.xlu1 %240  ;;  %v1467_v24 = vpop.permute.xlu0 %448 }
  0xb1   :  { %464 = vperm.xlu1 %1188, %v1401_v14   ;;  %v304_v45 = vmul.f32 %v1527_v58, %v1465_v23 }
  0xb4   :  { %v1472_v26 = vpop.permute.xlu0 %452 }
  0xb5   :  { %1189 = vset.pattern.permute.xlu1 %v1707_v9  ;;  %v68_v27 = vpop.permute.xlu1 %67 }
  0xb6   :  { %112 = vperm.xlu1 %1189, %v1470_v25   ;;  %v141_v50 = vmul.f32 %v1520_v55, %v68_v27 }
  0xb8   :  { %v1476_v28 = vpop.permute.xlu0 %472 }
  0xba   :  { %1190 = vset.pattern.permute.xlu1 %v1703_v0  ;;  %v1479_v29 = vpop.permute.xlu1 %336 }
  0xbb   :  { %368 = vperm.xlu1 %1190, %v1405_v15  }
  0xbc   :  { %v1482_v30 = vpop.permute.xlu0 %476 }
  0xbe   :  { %v341_v31 = vpop.permute.xlu1 %340 }
  0xbf   :  { %1191 = vset.pattern.permute.xlu1 %v1702_v1 }
  0xc0   :  { %196 = vperm.xlu1 %1191, %v1370_v11  }
  0xc1   :  { %v58_v32 = vpop.permute.xlu0 %57 }
  0xc2   :  { %v139_v48 = vmul.f32 %v1520_v55, %v58_v32 }
  0xc3   :  { %v1486_v33 = vpop.permute.xlu1 %168 }
  0xc4   :  { %200 = vperm.xlu1 %1191, %v1470_v25  }
  0xc5   :  { %v63_v34 = vpop.permute.xlu0 %62 }
  0xc6   :  { %v140_v57 = vmul.f32 %v1520_v55, %v63_v34 }
  0xc8   :  { %1192 = vset.pattern.permute.xlu1 %v1701_v7  ;;  %v245_v35 = vpop.permute.xlu1 %244  ;;  %v220_v63 = vadd.f32 %v1459_v21, %v140_v57 }
  0xc9   :  { %v73_v36 = vpop.permute.xlu0 %72  ;;  %280 = vperm.xlu1 %1192, %v1470_v25   ;;  %v305_v27 = vmul.f32 %v1527_v58, %v245_v35 }
  0xcd   :  { %1193 = vset.pattern.permute.xlu1 %v1705_v6  ;;  %v1492_v37 = vpop.permute.xlu1 %436  ;;  %v1494_v38 = vpop.permute.xlu0 %77 }
  0xce   :  { %468 = vperm.xlu1 %1193, %v1405_v15  }
  0xd1   :  { %v441_v40 = vpop.permute.xlu1 %440  ;;  %v1499_v41 = vpop.permute.xlu0 %102 }
  0xd2   :  { %1194 = vset.pattern.permute.xlu1 %v1707_v9 }
  0xd3   :  { %117 = vperm.xlu1 %1194, %v1497_v39  }
  0xd5   :  { %v1503_v42 = vpop.permute.xlu0 %107 }
  0xd6   :  { %v1505_v43 = vpop.permute.xlu1 %82 }
  0xd7   :  { %122 = vperm.xlu1 %1194, %v1409_v16  }
  0xd9   :  { %v1508_v44 = vpop.permute.xlu0 %132 }
  0xdb   :  { %1195 = vset.pattern.permute.xlu1 %v1703_v0  ;;  %v345_v46 = vpop.permute.xlu1 %344  ;;  %v320_v0 = vadd.f32 %v304_v45, %v220_v63 }
  0xdc   :  { %380 = vperm.xlu1 %1195, %v1470_v25  }
  0xde   :  { %v165_v47 = vpop.permute.xlu0 %164 }
  0xdf   :  { %v221_v21 = vadd.f32 %v165_v47, %v141_v50 }
  0xe0   :  { %1196 = vset.pattern.permute.xlu1 %v1702_v1  ;;  %v1513_v49 = vpop.permute.xlu1 %172  ;;  %v1543_v1 = vrot.slane %v38_v52, %v501_v62  ;;  %v219_v62 = vadd.f32 %v1454_v19, %v139_v48  ;;  %v143_v19 = vmul.f32 %v1520_v55, %v1494_v38 }
  0xe1   :  { %204 = vperm.xlu1 %1196, %v1497_v39   ;;  %v321_v63 = vadd.f32 %v305_v27, %v221_v21 }
  0xe2   :  { %v1516_v51 = vpop.permute.xlu0 %184  ;;  %v504_v23 = vmul.f32 %v1543_v1, %v441_v40 }
  0xe4   :  { %v1518_v53 = vpop.permute.xlu1 %176 }
  0xe5   :  { %1197 = vset.pattern.permute.xlu1 %v1701_v7  ;;  %v1541_v7 = vrot.slane %v38_v52, %v401_v61  ;;  %v1709_v61 = vmov 1  }
  0xe6   :  { %284 = vperm.xlu1 %1197, %v1497_v39   ;;  %v1524_v56 = vpop.permute.xlu0 %188 }
  0xe7   :  { %v404_v57 = vmul.f32 %v1541_v7, %v341_v31  ;;  %v403_v40 = vmul.f32 %v1541_v7, %v1479_v29  ;;  %v405_v35 = vmul.f32 %v1541_v7, %v345_v46  ;;  %v406_v47 = vmul.f32 %v1541_v7, %v1456_v20 }
  0xe8   :  { %v506_v20 = vmul.f32 %v1543_v1, %v1467_v24  ;;  %v507_v24 = vmul.f32 %v1543_v1, %v1472_v26 }
  0xe9   :  { %v1529_v59 = vpop.permute.xlu1 %256  ;;  %v420_v9 = vadd.f32 %v404_v57, %v320_v0  ;;  %v421_v29 = vadd.f32 %v405_v35, %v321_v63  ;;  %v407_v57 = vmul.f32 %v1541_v7, %v1461_v22 }
  0xea   :  { %288 = vperm.xlu1 %1197, %v1409_v16   ;;  %v1532_v60 = vpop.permute.xlu0 %208 }
  0xeb   :  { %v520_v31 = vadd.f32 %v504_v23, %v420_v9  ;;  %v503_v9 = vmul.f32 %v1543_v1, %v1492_v37  ;;  %v223_v37 = vadd.f32 %v1513_v49, %v143_v19 }
  0xed   :  { %vm536_vm0 = vcmp.gt.f32.partialorder %v520_v31, 0.0 }
  0xee   :  { %1199 = vset.pattern.permute.xlu1 %v1705_v6  ;;  %v445_v34 = vpop.permute.xlu1 %444  ;;  %v1539_v54 = vpop.permute.xlu0 %212  ;;  %v142_v6 = vmul.f32 %v1520_v55, %v73_v36 }
  0xef   :  { %1708 = vst [vmem:[#allocation11_spill] sm:$0xff] %v1539_v54  ;;  %480 = vperm.xlu1 %1199, %v1470_v25   ;;  %v505_v0 = vmul.f32 %v1543_v1, %v445_v34  ;;  %v1710_v34 = vmov 3  }
  0xf0   :  { %v222_v45 = vadd.f32 %v1486_v33, %v142_v6  ;;  %v552_v6 = vmul.f32 0.01, %v520_v31 }
  0xf1   :  { %v521_v33 = vadd.f32 %v505_v0, %v421_v29  ;;  %v1712_v29 = vmov 2  }
  0xf3   :  { %v237_v54 = vpop.permute.xlu0 %236  ;;  %1200 = vset.pattern.permute.xlu1 %v1709_v61  ;;  %v1552_v52 = vpop.permute.xlu1 %87  ;;  %vm537_vm2 = vcmp.gt.f32.partialorder %v521_v33, 0.0 }
  0xf4   :  { %v303_v32 = vmul.f32 %v1527_v58, %v237_v54  ;;  %127 = vperm.xlu1 %1200, %v1414_v17  }
  0xf6   :  { %v319_v36 = vadd.f32 %v303_v32, %v219_v62  ;;  %v568_v32 = vsel %vm536_vm0, %v520_v31, %v552_v6  ;;  %vm1300_vm0 = vmmov 0  }
  0xf7   :  { %v249_v50 = vpop.permute.xlu0 %248  ;;  %v1566_v54 = vpop.permute.xlu1 %92 }
  0xf8   :  { %v419_v48 = vadd.f32 %v403_v40, %v319_v36  ;;  %v306_v46 = vmul.f32 %v1527_v58, %v249_v50  ;;  %1202 = vset.pattern.permute.xlu1 %v1710_v34  ;;  %v553_v40 = vmul.f32 0.01, %v521_v33 }
  0xf9   :  { %384 = vperm.xlu1 %1202, %v1497_v39  }
  0xfa   :  { %v519_v38 = vadd.f32 %v503_v9, %v419_v48  ;;  %v322_v21 = vadd.f32 %v306_v46, %v222_v45  ;;  %v1711_v45 = vmov 0   ;;  %v569_v26 = vsel %vm537_vm2, %v521_v33, %v553_v40 }
  0xfb   :  { %v253_v23 = vpop.permute.xlu0 %252  ;;  %v144_v46 = vmul.f32 %v1520_v55, %v1505_v43 }
  0xfc   :  { %v422_v27 = vadd.f32 %v406_v47, %v322_v21  ;;  %v307_v61 = vmul.f32 %v1527_v58, %v253_v23  ;;  %v357_v62 = vpop.permute.xlu1 %356  ;;  %vm535_vm1 = vcmp.gt.f32.partialorder %v519_v38, 0.0  ;;  %v551_v63 = vmul.f32 0.01, %v519_v38 }
  0xfd   :  { %388 = vperm.xlu1 %1202, %v1409_v16   ;;  %v224_v33 = vadd.f32 %v1518_v53, %v144_v46  ;;  %v408_v21 = vmul.f32 %v1541_v7, %v357_v62 }
  0xfe   :  { %v522_v35 = vadd.f32 %v506_v20, %v422_v27  ;;  %v323_v0 = vadd.f32 %v307_v61, %v223_v37  ;;  %v567_v36 = vsel %vm535_vm1, %v519_v38, %v551_v63  ;;  %v308_v20 = vmul.f32 %v1527_v58, %v1529_v59 }
  0xff   :  { %v1094_v22 = vpack.c.bf16 %v568_v32, %v567_v36  ;;  %v1713_v38 = vmov 4   ;;  %v273_v37 = vpop.permute.xlu0 %272 }
 0x100   :  { %v423_v49 = vadd.f32 %v407_v57, %v323_v0  ;;  %vm538_vm3 = vcmp.gt.f32.partialorder %v522_v35, 0.0  ;;  %v554_v47 = vmul.f32 0.01, %v522_v35  ;;  %v324_v57 = vadd.f32 %v308_v20, %v224_v33 }
 0x101   :  { %1204 = vset.pattern.permute.xlu1 %v1711_v45  ;;  %v181_v19 = vpop.permute.xlu1 %180  ;;  %1095 = vmatprep.subr.bf16.mxu0 %v1094_v22 }
 0x102   :  { %v523_v50 = vadd.f32 %v507_v24, %v423_v49  ;;  %216 = vperm.xlu1 %1204, %v1393_v13   ;;  %1097 = vmatpush3.bf16.msra.mxu0 %v1094_v22  ;;  %v570_v9 = vsel %vm538_vm3, %v522_v35, %v554_v47  ;;  %v424_v27 = vadd.f32 %v408_v21, %v324_v57 }
 0x103   :  { %v1098_v31 = vpack.c.bf16 %v570_v9, %v569_v26  ;;  %v277_v62 = vpop.permute.xlu0 %276  ;;  %v312_v49 = vmul.f32 %v1527_v58, %v273_v37  ;;  %v583_v26 = vld [vmem:[#allocation2] sm:$0xff]  ;;  %v512_v9 = vmul.f32 %v1543_v1, %v1476_v28 }
 0x104   :  { %v555_v63 = vmul.f32 0.01, %v523_v50  ;;  %vm539_vm4 = vcmp.gt.f32.partialorder %v523_v50, 0.0  ;;  %1035 = vmatprep.mubr.f32.mxu0 %v583_v26 }
 0x105   :  { %1099 = vmatprep.subr.bf16.mxu0 %v1098_v31 }
 0x106   :  { %1205 = vset.pattern.permute.xlu1 %v1712_v29  ;;  %v261_v48 = vpop.permute.xlu1 %260  ;;  %1101 = vmatpush3.bf16.msra.mxu0 %v1098_v31  ;;  %v571_v24 = vsel %vm539_vm4, %v523_v50, %v555_v63  ;;  %v145_v29 = vmul.f32 %v1520_v55, %v1552_v52 }
 0x107   :  { %292 = vperm.xlu1 %1205, %v1414_v17   ;;  %v1602_v0 = vpop.permute.xlu0 %296  ;;  %v309_v46 = vmul.f32 %v1527_v58, %v261_v48 }
 0x108   :  { %v225_v33 = vadd.f32 %v181_v19, %v145_v29  ;;  %v513_v29 = vmul.f32 %v1543_v1, %v1482_v30 }
 0x10a   :  { %v265_v6 = vpop.permute.xlu1 %264  ;;  %v325_v37 = vadd.f32 %v309_v46, %v225_v33 }
 0x10b   :  { %1207 = vset.pattern.permute.xlu1 %v1713_v38  ;;  %v310_v28 = vmul.f32 %v1527_v58, %v265_v6 }
 0x10c   :  { %484 = vperm.xlu1 %1207, %v1497_v39   ;;  %v373_v22 = vpop.permute.xlu0 %372 }
 0x10d   :  { %v412_v50 = vmul.f32 %v1541_v7, %v373_v22 }
 0x10f   :  { %v457_v23 = vpop.permute.xlu1 %456 }
 0x110   :  { %v508_v61 = vmul.f32 %v1543_v1, %v457_v23  ;;  %488 = vperm.xlu1 %1207, %v1409_v16  }
 0x112   :  { %v524_v43 = vadd.f32 %v508_v61, %v424_v27 }
 0x114   :  { %vm540_vm5 = vcmp.gt.f32.partialorder %v524_v43, 0.0  ;;  %v556_v59 = vmul.f32 0.01, %v524_v43  ;;  %1208 = vset.pattern.permute.xlu1 %v1710_v34  ;;  %v1597_v53 = vpop.permute.xlu1 %97  ;;  %v148_v34 = vmul.f32 %v1520_v55, %v1499_v41 }
 0x115   :  { %396 = vperm.xlu1 %1208, %v1393_v13  }
 0x116   :  { %v572_v32 = vsel %vm540_vm5, %v524_v43, %v556_v59 }
 0x117   :  { %v1102_v40 = vpack.c.bf16 %v572_v32, %v571_v24 }
 0x119   :  { %1209 = vset.pattern.permute.xlu1 %v1713_v38  ;;  %v361_v35 = vpop.permute.xlu1 %360  ;;  %1103 = vmatprep.subr.bf16.mxu0 %v1102_v40  ;;  %v146_v38 = vmul.f32 %v1520_v55, %v1566_v54 }
 0x11a   :  { %492 = vperm.xlu1 %1209, %v1414_v17   ;;  %1105 = vmatpush3.bf16.msra.mxu0 %v1102_v40  ;;  %v409_v21 = vmul.f32 %v1541_v7, %v361_v35 }
 0x11b   :  { %v226_v27 = vadd.f32 %v1516_v51, %v146_v38 }
 0x11c   :  { %v425_v61 = vadd.f32 %v409_v21, %v325_v37 }
 0x11d   :  { %v365_v36 = vpop.permute.xlu1 %364  ;;  %v326_v43 = vadd.f32 %v310_v28, %v226_v27 }
 0x11e   :  { %v410_v52 = vmul.f32 %v1541_v7, %v365_v36  ;;  %v149_v36 = vmul.f32 %v1520_v55, %v1503_v42  ;;  %v147_v42 = vmul.f32 %v1520_v55, %v1597_v53 }
 0x120   :  { %v426_v54 = vadd.f32 %v410_v52, %v326_v43  ;;  %v227_v30 = vadd.f32 %v1524_v56, %v147_v42 }
 0x122   :  { %v193_v47 = vpop.permute.xlu1 %192 }
 0x123   :  { %v228_v45 = vadd.f32 %v193_v47, %v148_v34  ;;  %v313_v47 = vmul.f32 %v1527_v58, %v277_v62 }
 0x125   :  { %v328_v31 = vadd.f32 %v312_v49, %v228_v45  ;;  %v377_v49 = vpop.permute.xlu0 %376 }
 0x126   :  { %v413_v26 = vmul.f32 %v1541_v7, %v377_v49 }
 0x127   :  { %v428_v20 = vadd.f32 %v412_v50, %v328_v31  ;;  %v269_v41 = vpop.permute.xlu1 %268 }
 0x128   :  { %v311_v38 = vmul.f32 %v1527_v58, %v269_v41 }
 0x129   :  { %v1616_v57 = vadd.f32 %v512_v9, %v428_v20  ;;  %v1298_v20 = vmov 5  }
 0x12a   :  { %1211 = vset.pattern.permute.xlu1 %v1298_v20  ;;  %1212 = vset.pattern.permute.xlu0 %v1298_v20  ;;  %v327_v37 = vadd.f32 %v311_v38, %v227_v30  ;;  %v393_v20 = vpop.permute.xlu0 %392 }
 0x12b   :  { %600 = vperm.xlu1 %1211, %v1347_v3   ;;  %608 = vperm.xlu0 %1212, %v1361_v8   ;;  %v560_v53 = vmul.f32 0.01, %v1616_v57  ;;  %vm544_vm8 = vcmp.gt.f32.partialorder %v1616_v57, 0.0 }
 0x12c   :  { %v461_v23 = vpop.permute.xlu1 %460 }
 0x12d   :  { %v509_v48 = vmul.f32 %v1543_v1, %v461_v23 }
 0x12f   :  { %v525_v63 = vadd.f32 %v509_v48, %v425_v61  ;;  %604 = vperm.xlu1 %1211, %v1353_v5   ;;  %620 = vperm.xlu0 %1212, %v1388_v12  }
 0x130   :  { %v465_v59 = vpop.permute.xlu1 %464 }
 0x131   :  { %v510_v19 = vmul.f32 %v1543_v1, %v465_v59  ;;  %v557_v24 = vmul.f32 0.01, %v525_v63  ;;  %vm541_vm6 = vcmp.gt.f32.partialorder %v525_v63, 0.0 }
 0x133   :  { %v526_v32 = vadd.f32 %v510_v19, %v426_v54  ;;  %v573_v35 = vsel %vm541_vm6, %v525_v63, %v557_v24  ;;  %612 = vperm.xlu1 %1211, %v1345_v2   ;;  %628 = vperm.xlu0 %1212, %v1401_v14   ;;  %v576_v2 = vsel %vm544_vm8, %v1616_v57, %v560_v53 }
 0x135   :  { %vm542_vm7 = vcmp.gt.f32.partialorder %v526_v32, 0.0  ;;  %v558_v40 = vmul.f32 0.01, %v526_v32  ;;  %v113_v6 = vpop.permute.xlu1 %112 }
 0x137   :  { %v574_v34 = vsel %vm542_vm7, %v526_v32, %v558_v40  ;;  %616 = vperm.xlu1 %1211, %v1351_v4   ;;  %636 = vperm.xlu0 %1212, %v1366_v10   ;;  %v154_v32 = vmul.f32 %v1520_v55, %v1508_v44 }
 0x138   :  { %v1106_v51 = vpack.c.bf16 %v574_v34, %v573_v35 }
 0x13a   :  { %v369_v22 = vpop.permute.xlu1 %368  ;;  %1107 = vmatprep.subr.bf16.mxu0 %v1106_v51 }
 0x13b   :  { %1109 = vmatpush3.bf16.msra.mxu0 %v1106_v51  ;;  %v411_v21 = vmul.f32 %v1541_v7, %v369_v22  ;;  %624 = vperm.xlu1 %1211, %v1419_v18   ;;  %v150_v18 = vmul.f32 %v1520_v55, %v113_v6  ;;  %v318_v6 = vmul.f32 %v1527_v58, %v1602_v0 }
 0x13c   :  { %644 = vperm.xlu0 %1212, %v1470_v25  }
 0x13d   :  { %v427_v3 = vadd.f32 %v411_v21, %v327_v37 }
 0x13f   :  { %v197_v45 = vpop.permute.xlu1 %196  ;;  %632 = vperm.xlu1 %1211, %v1405_v15  }
 0x140   :  { %v229_v50 = vadd.f32 %v197_v45, %v149_v36  ;;  %652 = vperm.xlu0 %1212, %v1409_v16  }
 0x142   :  { %v329_v9 = vadd.f32 %v313_v47, %v229_v50 }
 0x143   :  { %v201_v31 = vpop.permute.xlu1 %200  ;;  %640 = vperm.xlu1 %1211, %v1370_v11  }
 0x144   :  { %v429_v46 = vadd.f32 %v413_v26, %v329_v9  ;;  %660 = vperm.xlu0 %1212, %v1393_v13   ;;  %v230_v61 = vadd.f32 %v201_v31, %v150_v18 }
 0x146   :  { %v529_v62 = vadd.f32 %v513_v29, %v429_v46 }
 0x147   :  { %648 = vperm.xlu1 %1211, %v1497_v39  }
 0x148   :  { %v281_v33 = vpop.permute.xlu1 %280  ;;  %v561_v13 = vmul.f32 0.01, %v529_v62  ;;  %vm545_vm10 = vcmp.gt.f32.partialorder %v529_v62, 0.0 }
 0x149   :  { %v314_v25 = vmul.f32 %v1527_v58, %v281_v33 }
 0x14b   :  { %656 = vperm.xlu1 %1211, %v1414_v17   ;;  %v330_v16 = vadd.f32 %v314_v25, %v230_v61  ;;  %v577_v17 = vsel %vm545_vm10, %v529_v62, %v561_v13  ;;  %v587_v13 = vld [vmem:[#allocation2 + $0x20] sm:$0xff] }
 0x14d   :  { %v469_v28 = vpop.permute.xlu1 %468 }
 0x14e   :  { %v511_v8 = vmul.f32 %v1543_v1, %v469_v28 }
 0x150   :  { %v527_v41 = vadd.f32 %v511_v8, %v427_v3  ;;  %v497_v3 = vpop.permute.xlu0 %496 }
 0x152   :  { %vm543_vm9 = vcmp.gt.f32.partialorder %v527_v41, 0.0  ;;  %v559_v5 = vmul.f32 0.01, %v527_v41  ;;  %v118_v12 = vpop.permute.xlu1 %117 }
 0x153   :  { %v151_v51 = vmul.f32 %v1520_v55, %v118_v12  ;;  %v518_v12 = vmul.f32 %v1543_v1, %v497_v3 }
 0x154   :  { %v575_v56 = vsel %vm543_vm9, %v527_v41, %v559_v5 }
 0x155   :  { %v1110_v23 = vpack.c.bf16 %v576_v2, %v575_v56 }
 0x156   :  { %v123_v14 = vpop.permute.xlu1 %122 }
 0x157   :  { %1111 = vmatprep.subr.bf16.mxu0 %v1110_v23  ;;  %v152_v49 = vmul.f32 %v1520_v55, %v123_v14 }
 0x158   :  { %1113 = vmatpush3.bf16.msra.mxu0 %v1110_v23 }
 0x159   :  { %v232_v9 = vadd.f32 %v1532_v60, %v152_v49  ;;  %v1714_v60 = vld [vmem:[#allocation11_spill] sm:$0xff] }
 0x15b   :  { %v381_v4 = vpop.permute.xlu1 %380 }
 0x15c   :  { %v414_v15 = vmul.f32 %v1541_v7, %v381_v4 }
 0x15e   :  { %v430_v48 = vadd.f32 %v414_v15, %v330_v16 }
 0x160   :  { %v205_v10 = vpop.permute.xlu1 %204 }
 0x161   :  { %v231_v47 = vadd.f32 %v205_v10, %v151_v51  ;;  %v1302_v51 = vmov 6  }
 0x162   :  { %1213 = vset.pattern.permute.xlu1 %v1302_v51  ;;  %1214 = vset.pattern.permute.xlu0 %v1302_v51 }
 0x165   :  { %v285_v57 = vpop.permute.xlu1 %284 }
 0x166   :  { %v315_v22 = vmul.f32 %v1527_v58, %v285_v57 }
 0x168   :  { %v331_v50 = vadd.f32 %v315_v22, %v231_v47 }
 0x169   :  { %v289_v27 = vpop.permute.xlu1 %288 }
 0x16a   :  { %v316_v26 = vmul.f32 %v1527_v58, %v289_v27 }
 0x16c   :  { %v332_v46 = vadd.f32 %v316_v26, %v232_v9 }
 0x16e   :  { %v481_v52 = vpop.permute.xlu1 %480 }
 0x16f   :  { %v514_v11 = vmul.f32 %v1543_v1, %v481_v52 }
 0x171   :  { %v530_v43 = vadd.f32 %v514_v11, %v430_v48  ;;  %v585_v48 = vld [vmem:[#allocation2 + $0x10] sm:$0xff]  ;;  %v586_v11 = vld [vmem:[#allocation2 + $0x18] sm:$0xff] }
 0x173   :  { %vm546_vm11 = vcmp.gt.f32.partialorder %v530_v43, 0.0  ;;  %v562_v39 = vmul.f32 0.01, %v530_v43  ;;  %v128_v63 = vpop.permute.xlu1 %127 }
 0x174   :  { %v153_v38 = vmul.f32 %v1520_v55, %v128_v63  ;;  %v417_v55 = vmul.f32 %v1541_v7, %v393_v20  ;;  %v591_v63 = vld [vmem:[#allocation2 + $0x40] sm:$0xff] }
 0x175   :  { %v578_v59 = vsel %vm546_vm11, %v530_v43, %v562_v39  ;;  %v589_v43 = vld [vmem:[#allocation2 + $0x30] sm:$0xff]  ;;  %v590_v39 = vld [vmem:[#allocation2 + $0x38] sm:$0xff] }
 0x176   :  { %v1114_v54 = vpack.c.bf16 %v578_v59, %v577_v17  ;;  %v233_v8 = vadd.f32 %v1714_v60, %v153_v38  ;;  %v592_v17 = vld [vmem:[#allocation2 + $0x48] sm:$0xff]  ;;  %v593_v59 = vld [vmem:[#allocation2 + $0x50] sm:$0xff] }
 0x178   :  { %v385_v19 = vpop.permute.xlu1 %384  ;;  %1115 = vmatprep.subr.bf16.mxu0 %v1114_v54 }
 0x179   :  { %1117 = vmatpush3.bf16.msra.mxu0 %v1114_v54  ;;  %v415_v45 = vmul.f32 %v1541_v7, %v385_v19  ;;  %v594_v54 = vld [vmem:[#allocation2 + $0x58] sm:$0xff]  ;;  %v595_v19 = vld [vmem:[#allocation2 + $0x60] sm:$0xff] }
 0x17b   :  { %v431_v31 = vadd.f32 %v415_v45, %v331_v50 }
 0x17c   :  { %v389_v24 = vpop.permute.xlu1 %388 }
 0x17d   :  { %v416_v0 = vmul.f32 %v1541_v7, %v389_v24  ;;  %v596_v24 = vld [vmem:[#allocation2 + $0x68] sm:$0xff] }
 0x17f   :  { %v432_v33 = vadd.f32 %v416_v0, %v332_v46 }
 0x181   :  { %v217_v40 = vpop.permute.xlu1 %216 }
 0x182   :  { %v234_v35 = vadd.f32 %v217_v40, %v154_v32  ;;  %v597_v32 = vld [vmem:[#allocation2 + $0x70] sm:$0xff]  ;;  %v598_v40 = vld [vmem:[#allocation2 + $0x78] sm:$0xff] }
 0x184   :  { %v334_v34 = vadd.f32 %v318_v6, %v234_v35  ;;  %v1299_v6 = vmov 0.0|0.0   ;;  %v1301_v35 = vmov 0.0  }
 0x185   :  { %1126 = vmatprep.subr.bf16.mxu1 %v1299_v6  ;;  %1091 = vmatprep.mubr.msk.f32.mxu1 %vm1300_vm0, %v1301_v35 }
 0x186   :  { %v293_v36 = vpop.permute.xlu1 %292 }
 0x187   :  { %v317_v21 = vmul.f32 %v1527_v58, %v293_v36 }
 0x189   :  { %v333_v56 = vadd.f32 %v317_v21, %v233_v8 }
 0x18b   :  { %v485_v44 = vpop.permute.xlu1 %484  ;;  %v433_v57 = vadd.f32 %v417_v55, %v333_v56 }
 0x18c   :  { %v515_v29 = vmul.f32 %v1543_v1, %v485_v44 }
 0x18e   :  { %v531_v42 = vadd.f32 %v515_v29, %v431_v31 }
 0x18f   :  { %v489_v62 = vpop.permute.xlu1 %488 }
 0x190   :  { %v516_v30 = vmul.f32 %v1543_v1, %v489_v62  ;;  %v563_v37 = vmul.f32 0.01, %v531_v42  ;;  %vm547_vm12 = vcmp.gt.f32.partialorder %v531_v42, 0.0 }
 0x192   :  { %v532_v28 = vadd.f32 %v516_v30, %v432_v33  ;;  %v579_v2 = vsel %vm547_vm12, %v531_v42, %v563_v37 }
 0x194   :  { %vm548_vm13 = vcmp.gt.f32.partialorder %v532_v28, 0.0  ;;  %v564_v53 = vmul.f32 0.01, %v532_v28  ;;  %v397_v41 = vpop.permute.xlu1 %396 }
 0x195   :  { %v418_v5 = vmul.f32 %v1541_v7, %v397_v41  ;;  %v584_v7 = vld [vmem:[#allocation2 + $0x8] sm:$0xff] }
 0x196   :  { %v580_v23 = vsel %vm548_vm13, %v532_v28, %v564_v53 }
 0x197   :  { %v434_v14 = vadd.f32 %v418_v5, %v334_v34  ;;  %v1118_v58 = vpack.c.bf16 %v580_v23, %v579_v2  ;;  %v927_v34 = vld [vmem:[#allocation2 + $0x88] sm:$0x1] }
 0x198   :  { %930 = vperm.xlu1 %1213, %v927_v34  }
 0x199   :  { %v534_v4 = vadd.f32 %v518_v12, %v434_v14  ;;  %v493_v10 = vpop.permute.xlu1 %492  ;;  %1119 = vmatprep.subr.bf16.mxu0 %v1118_v58 }
 0x19a   :  { %v517_v18 = vmul.f32 %v1543_v1, %v493_v10  ;;  %1121 = vmatpush3.bf16.msra.mxu0 %v1118_v58  ;;  %v588_v1 = vld [vmem:[#allocation2 + $0x28] sm:$0xff] }
 0x19b   :  { %v566_v25 = vmul.f32 0.01, %v534_v4  ;;  %vm550_vm14 = vcmp.gt.f32.partialorder %v534_v4, 0.0 }
 0x19c   :  { %v533_v27 = vadd.f32 %v517_v18, %v433_v57 }
 0x19d   :  { %v582_v16 = vsel %vm550_vm14, %v534_v4, %v566_v25 }
 0x19e   :  { %vm549_vm15 = vcmp.gt.f32.partialorder %v533_v27, 0.0  ;;  %v565_v61 = vmul.f32 0.01, %v533_v27 }
 0x1a0   :  { %v581_v15 = vsel %vm549_vm15, %v533_v27, %v565_v61 }
 0x1a1   :  { %v1122_v52 = vpack.c.bf16 %v582_v16, %v581_v15 }
 0x1a3   :  { %1123 = vmatprep.subr.bf16.mxu0 %v1122_v52 }
 0x1a4   :  { %1125 = vmatpush3.bf16.msra.mxu0 %v1122_v52 }
 0x1a7   :  { %1036 = vmatmul.mubr.f32.vlgmr.msra.gmra.mrb[0].mxu0 %v584_v7 }
 0x1a8   :  { %1038 = vmatprep.mubr.f32.mxu0 %v585_v48 }
 0x1aa   :  { %v601_v22 = vpop.permute.xlu1 %600  ;;  %v609_v49 = vpop.permute.xlu0 %608 }
 0x1ab   :  { %1039 = vmatmul.mubr.f32.gmra.mrb[2].mxu0 %v586_v11 }
 0x1ac   :  { %1041 = vmatprep.mubr.f32.mxu0 %v587_v13 }
 0x1ae   :  { %v605_v36 = vpop.permute.xlu1 %604  ;;  %v621_v45 = vpop.permute.xlu0 %620 }
 0x1af   :  { %1042 = vmatmul.mubr.f32.gmra.mrb[4].mxu0 %v588_v1 }
 0x1b0   :  { %1044 = vmatprep.mubr.f32.mxu0 %v589_v43 }
 0x1b2   :  { %v613_v47 = vpop.permute.xlu1 %612  ;;  %v629_v29 = vpop.permute.xlu0 %628 }
 0x1b3   :  { %1045 = vmatmul.mubr.f32.gmra.mrb[6].mxu0 %v590_v39 }
 0x1b4   :  { %1047 = vmatprep.mubr.f32.mxu0 %v591_v63 }
 0x1b6   :  { %v617_v50 = vpop.permute.xlu1 %616  ;;  %v637_v5 = vpop.permute.xlu0 %636 }
 0x1b7   :  { %1048 = vmatmul.mubr.f32.gmra.mrb[8].mxu0 %v592_v17 }
 0x1b8   :  { %1050 = vmatprep.mubr.f32.mxu0 %v593_v59 }
 0x1ba   :  { %v625_v42 = vpop.permute.xlu1 %624 }
 0x1bb   :  { %1051 = vmatmul.mubr.f32.gmra.mrb[10].mxu0 %v594_v54  ;;  %v645_v15 = vpop.permute.xlu0 %644 }
 0x1bc   :  { %1053 = vmatprep.mubr.f32.mxu0 %v595_v19 }
 0x1be   :  { %v633_v55 = vpop.permute.xlu1 %632 }
 0x1bf   :  { %1054 = vmatmul.mubr.f32.gmra.mrb[12].mxu0 %v596_v24 }
 0x1c0   :  { %1056 = vmatprep.mubr.f32.mxu0 %v597_v32  ;;  %v653_v32 = vpop.permute.xlu0 %652 }
 0x1c2   :  { %v641_v7 = vpop.permute.xlu1 %640 }
 0x1c3   :  { %1057 = vmatmul.mubr.f32.gmra.mrb[14].mxu0 %v598_v40 }
 0x1c6   :  { %v649_v34 = vpop.permute.xlu1 %648 }
 0x27a   :  { %v1037_v26 = vpop.f32.mrb[0].mxu0 }
 0x27b   :  { %v735_v44 = vadd.f32 %v1037_v26, %v605_v36  ;;  %v729_v9 = vpop.f32.mrb[1].mxu0 }
 0x27c   :  { %v730_v31 = vadd.f32 %v729_v9, %v601_v22 }
 0x27d   :  { %v825_v0 = vmul.f32 0.01, %v735_v44  ;;  %vm809_vm1 = vcmp.gt.f32.partialorder %v735_v44, 0.0 }
 0x27e   :  { %v824_v46 = vmul.f32 0.01, %v730_v31  ;;  %v1040_v20 = vpop.f32.mrb[2].mxu0  ;;  %vm808_vm2 = vcmp.gt.f32.partialorder %v730_v31, 0.0 }
 0x27f   :  { %v745_v62 = vadd.f32 %v1040_v20, %v613_v47  ;;  %v739_v38 = vpop.f32.mrb[3].mxu0  ;;  %v841_v33 = vsel %vm809_vm1, %v735_v44, %v825_v0  ;;  %v661_v0 = vpop.permute.xlu0 %660  ;;  %vm936_vm1 = vcmask 57344  }
 0x280   :  { %v740_v30 = vadd.f32 %v739_v38, %v609_v49  ;;  %v840_v21 = vsel %vm808_vm2, %v730_v31, %v824_v46  ;;  %v657_v20 = vpop.permute.xlu1 %656 }
 0x281   :  { %vm811_vm3 = vcmp.gt.f32.partialorder %v745_v62, 0.0  ;;  %v827_v37 = vmul.f32 0.01, %v745_v62  ;;  %v1127_v28 = vpack.c.bf16 %v841_v33, %v840_v21 }
 0x282   :  { %vm810_vm4 = vcmp.gt.f32.partialorder %v740_v30, 0.0  ;;  %v826_v3 = vmul.f32 0.01, %v740_v30  ;;  %v1043_v60 = vpop.f32.mrb[4].mxu0 }
 0x283   :  { %v755_v8 = vadd.f32 %v1043_v60, %v621_v45  ;;  %v749_v53 = vpop.f32.mrb[5].mxu0  ;;  %1128 = vmatpush3.bf16.msra.mxu1 %v1127_v28  ;;  %v843_v41 = vsel %vm811_vm3, %v745_v62, %v827_v37 }
 0x284   :  { %v750_v12 = vadd.f32 %v749_v53, %v617_v50  ;;  %1129 = vmatprep.subr.bf16.mxu1 %v1299_v6  ;;  %v842_v56 = vsel %vm810_vm4, %v740_v30, %v826_v3  ;;  %v856_v53 = vld [vmem:[#allocation2 + $0x80] sm:$0xff] }
 0x285   :  { %vm813_vm5 = vcmp.gt.f32.partialorder %v755_v8, 0.0  ;;  %v829_v2 = vmul.f32 0.01, %v755_v8  ;;  %v1130_v23 = vpack.c.bf16 %v843_v41, %v842_v56  ;;  %v931_v41 = vpop.permute.xlu1 %930 }
 0x286   :  { %vm812_vm6 = vcmp.gt.f32.partialorder %v750_v12, 0.0  ;;  %v828_v14 = vmul.f32 0.01, %v750_v12  ;;  %v1046_v58 = vpop.f32.mrb[6].mxu0 }
 0x287   :  { %v765_v4 = vadd.f32 %v1046_v58, %v629_v29  ;;  %v759_v10 = vpop.f32.mrb[7].mxu0  ;;  %1131 = vmatpush3.bf16.msra.mxu1 %v1130_v23  ;;  %v845_v57 = vsel %vm813_vm5, %v755_v8, %v829_v2 }
 0x288   :  { %v760_v18 = vadd.f32 %v759_v10, %v625_v42  ;;  %1132 = vmatprep.subr.bf16.mxu1 %v1299_v6  ;;  %v844_v25 = vsel %vm812_vm6, %v750_v12, %v828_v14 }
 0x289   :  { %vm815_vm7 = vcmp.gt.f32.partialorder %v765_v4, 0.0  ;;  %v831_v27 = vmul.f32 0.01, %v765_v4  ;;  %v1133_v61 = vpack.c.bf16 %v845_v57, %v844_v25 }
 0x28a   :  { %vm814_vm8 = vcmp.gt.f32.partialorder %v760_v18, 0.0  ;;  %v830_v16 = vmul.f32 0.01, %v760_v18  ;;  %v1049_v52 = vpop.f32.mrb[8].mxu0 }
 0x28b   :  { %v775_v48 = vadd.f32 %v1049_v52, %v637_v5  ;;  %v769_v11 = vpop.f32.mrb[9].mxu0  ;;  %1134 = vmatpush3.bf16.msra.mxu1 %v1133_v61  ;;  %v847_v13 = vsel %vm815_vm7, %v765_v4, %v831_v27 }
 0x28c   :  { %v770_v1 = vadd.f32 %v769_v11, %v633_v55  ;;  %1135 = vmatprep.subr.bf16.mxu1 %v1299_v6  ;;  %v846_v43 = vsel %vm814_vm8, %v760_v18, %v830_v16 }
 0x28d   :  { %vm817_vm9 = vcmp.gt.f32.partialorder %v775_v48, 0.0  ;;  %v833_v39 = vmul.f32 0.01, %v775_v48  ;;  %v1136_v63 = vpack.c.bf16 %v847_v13, %v846_v43 }
 0x28e   :  { %vm816_vm10 = vcmp.gt.f32.partialorder %v770_v1, 0.0  ;;  %v832_v17 = vmul.f32 0.01, %v770_v1  ;;  %v1052_v59 = vpop.f32.mrb[10].mxu0 }
 0x28f   :  { %v785_v54 = vadd.f32 %v1052_v59, %v645_v15  ;;  %v779_v19 = vpop.f32.mrb[11].mxu0  ;;  %1137 = vmatpush3.bf16.msra.mxu1 %v1136_v63  ;;  %v849_v24 = vsel %vm817_vm9, %v775_v48, %v833_v39 }
 0x290   :  { %v780_v40 = vadd.f32 %v779_v19, %v641_v7  ;;  %1138 = vmatprep.subr.bf16.mxu1 %v1299_v6  ;;  %v848_v35 = vsel %vm816_vm10, %v770_v1, %v832_v17 }
 0x291   :  { %vm819_vm11 = vcmp.gt.f32.partialorder %v785_v54, 0.0  ;;  %v835_v51 = vmul.f32 0.01, %v785_v54  ;;  %v1139_v22 = vpack.c.bf16 %v849_v24, %v848_v35 }
 0x292   :  { %vm818_vm12 = vcmp.gt.f32.partialorder %v780_v40, 0.0  ;;  %v834_v36 = vmul.f32 0.01, %v780_v40  ;;  %v1055_v49 = vpop.f32.mrb[12].mxu0 }
 0x293   :  { %v795_v47 = vadd.f32 %v1055_v49, %v653_v32  ;;  %v789_v45 = vpop.f32.mrb[13].mxu0  ;;  %1140 = vmatpush3.bf16.msra.mxu1 %v1139_v22  ;;  %v851_v50 = vsel %vm819_vm11, %v785_v54, %v835_v51 }
 0x294   :  { %v790_v26 = vadd.f32 %v789_v45, %v649_v34  ;;  %1141 = vmatprep.subr.bf16.mxu1 %v1299_v6  ;;  %v850_v44 = vsel %vm818_vm12, %v780_v40, %v834_v36 }
 0x295   :  { %vm821_vm13 = vcmp.gt.f32.partialorder %v795_v47, 0.0  ;;  %v837_v9 = vmul.f32 0.01, %v795_v47  ;;  %v1142_v31 = vpack.c.bf16 %v851_v50, %v850_v44 }
 0x296   :  { %vm820_vm14 = vcmp.gt.f32.partialorder %v790_v26, 0.0  ;;  %v836_v29 = vmul.f32 0.01, %v790_v26  ;;  %v1058_v46 = vpop.f32.mrb[14].mxu0 }
 0x297   :  { %v805_v42 = vadd.f32 %v1058_v46, %v661_v0  ;;  %v799_v62 = vpop.f32.mrb[15].mxu0  ;;  %1143 = vmatpush3.bf16.msra.mxu1 %v1142_v31  ;;  %v853_v38 = vsel %vm821_vm13, %v795_v47, %v837_v9 }
 0x298   :  { %v800_v33 = vadd.f32 %v799_v62, %v657_v20  ;;  %1144 = vmatprep.subr.bf16.mxu1 %v1299_v6  ;;  %v852_v30 = vsel %vm820_vm14, %v790_v26, %v836_v29 }
 0x299   :  { %vm823_vm15 = vcmp.gt.f32.partialorder %v805_v42, 0.0  ;;  %v839_v21 = vmul.f32 0.01, %v805_v42  ;;  %v1145_v37 = vpack.c.bf16 %v853_v38, %v852_v30 }
 0x29a   :  { %vm822_vm0 = vcmp.gt.f32.partialorder %v800_v33, 0.0  ;;  %v838_v28 = vmul.f32 0.01, %v800_v33 }
 0x29b   :  { %1146 = vmatpush3.bf16.msra.mxu1 %v1145_v37  ;;  %v855_v3 = vsel %vm823_vm15, %v805_v42, %v839_v21 }
 0x29c   :  { %1147 = vmatprep.subr.bf16.mxu1 %v1299_v6  ;;  %v854_v60 = vsel %vm822_vm0, %v800_v33, %v838_v28 }
 0x29d   :  { %v1148_v8 = vpack.c.bf16 %v855_v3, %v854_v60 }
 0x29f   :  { %1149 = vmatpush3.bf16.msra.mxu1 %v1148_v8 }
 0x2a2   :  { %1092 = vmatmul.mubr.f32.vlgmr.msra.gmra.mrb[0].mxu1 %v856_v53 }
 0x375   :  { %v923_v5 = vpop.f32.mrb[0].mxu1 }
 0x376   :  { %v933_v12 = vadd.f32 %v931_v41, %v923_v5  ;;  %v1093_v56 = vpop.f32.mrb[1].mxu1 }
 0x378   :  { %1215 = vtanh.f32 %v933_v12 }
 0x382   :  { %v1216_v55 = vpop.eup %1215 }
 0x383   :  { %v935_v2 = vmul.f32 1.5, %v1216_v55 }
 0x385   :  { %937 = vst.msk [vmem:[#allocation7] sm:$0x1] %vm936_vm1, %v935_v2 }
 0x386   :  { %1272 = shalt.err (!%p1269_p6)
}
 0x387   :  { %s1273_s11 = scalar_lea.hbm %s1700_s2, 16 }
 0x388   :  { %p1274_p7 = scmp.ne.s32.totalorder %s1700_s2, %s1273_s11  ;;  %p1277_p8 = scmp.lt.u32.totalorder %s1273_s11, %s1700_s2 }
 0x38a   :  { %p1279_p9 = pnand %p1277_p8, %p1274_p7 }
 0x38c   :  { %1282 = shalt.err (!%p1279_p9)
}
 0x38d   :  { %947 = dma.vmem_to_hbm [thread:$0]  %s945_s6, 16, %s1700_s2, [#allocation4]  }
 0x38e   :  { %1287 = dma.done.wait [#allocation4], 16  }
 0x38f   :  { %1288 = vsyncadd [#allocation4], 4294967280 }
 0x390   :  { %951 = vsyncpa [#allocation3], 1 }
 0x391   :  { %952 = vsyncpa [#allocation6], 1 }
 0x392   :  { %953 = vsyncpa [#allocation4], 1 }

</bundles_post_ra>
